<compile_context>
chip_gen: v6e
topology: v6e:2x2x1
jax: 0.10.0
libtpu: 0.0.40
codegen_flags: <defaults>
</compile_context>

<pallas_src>
import functools

import jax
import jax.numpy as jnp
from jax.experimental import pallas as pl
from jax.experimental.pallas import tpu as pltpu

GAMMA = 2.0   # self.y in the PyTorch module (focusing parameter)
ALPHA = 0.25


def _make_focal_kernel(gamma, rows_in_last, needs_row_mask):
    def kernel(logits_ref, target_ref, partial_ref):
        x = logits_ref[...].astype(jnp.float32)            # (TN, C) f32
        t = target_ref[...]                                # (TN, 1) int32
        tn, c = x.shape

        # One-hot gather of the target logit: (1, C) lane iota, broadcast
        # against the (TN, 1) targets by the compare. Independent of the
        # max/exp chain so the scheduler can overlap them.
        col = jax.lax.broadcasted_iota(jnp.int32, (1, c), 1)
        x_t = jnp.sum(jnp.where(col == t, x, 0.0), axis=-1, keepdims=True)

        # Numerically stable log-sum-exp.
        m = jnp.max(x, axis=-1, keepdims=True)              # (TN, 1)
        s = jnp.sum(jnp.exp(x - m), axis=-1, keepdims=True)  # (TN, 1)

        log_pt = (x_t - m) - jnp.log(s)                     # log_softmax at target
        pt = jnp.exp(log_pt)                                # softmax at target
        one_minus_pt = 1.0 - pt
        if gamma == 2.0:
            focus = one_minus_pt * one_minus_pt
        elif gamma == 1.0:
            focus = one_minus_pt
        else:
            # Clamp: rounding can make one_minus_pt infinitesimally negative.
            focus = jnp.power(jnp.maximum(one_minus_pt, 0.0), jnp.float32(gamma))

        weight_nll = focus * (-log_pt)          # alpha and 1/N folded in wrapper

        if not needs_row_mask:
            partial_ref[0, 0] = jnp.sum(weight_nll)
        else:
            i = pl.program_id(0)
            last = pl.num_programs(0) - 1

            @pl.when(i != last)
            def _():
                partial_ref[0, 0] = jnp.sum(weight_nll)

            @pl.when(i == last)
            def _():
                # Keep this a select: padded rows of a ragged last tile may
                # hold garbage/NaN and must be discarded, not multiplied by 0.
                row = jax.lax.broadcasted_iota(jnp.int32, (tn, 1), 0)
                masked = jnp.where(row < rows_in_last, weight_nll, 0.0)
                partial_ref[0, 0] = jnp.sum(masked)

    return kernel


@functools.partial(
    jax.jit,
    static_argnames=("gamma", "alpha", "tile_rows", "tile_budget_bytes"),
)
def focal_loss(logits, target, gamma=GAMMA, alpha=ALPHA, tile_rows=None,
               tile_budget_bytes=2 << 20):
    """logits: (N, C) float; target: (N,) int class indices -> scalar loss."""
    n, c = logits.shape
    itemsize = jnp.dtype(logits.dtype).itemsize

    # Byte-driven row tile (override with tile_rows for testing).
    if tile_rows is not None:
        budget_rows = int(tile_rows)
    else:
        budget_rows = max(8, tile_budget_bytes // (c * itemsize))
    if n <= budget_rows:
        tn = n                              # whole array, single grid step
    else:
        tn = max(8, (min(budget_rows, n) // 8) * 8)

    grid = pl.cdiv(n, tn)
    needs_row_mask = (n % tn) != 0
    rows_in_last = n - (grid - 1) * tn

    target2d = target.reshape(n, 1).astype(jnp.int32)
    kernel = _make_focal_kernel(float(gamma), rows_in_last, needs_row_mask)

    # VMEM budget: double-buffered logits stream + headroom for the in-kernel
    # f32 upcast / exp temporaries. Lift v5e's 16 MiB scoped default; stay
    # well under v7x's 64 MiB physical VMEM.
    tile_in_bytes = tn * c * itemsize
    tile_f32_bytes = tn * c * 4
    vmem_bytes = 2 * tile_in_bytes + 4 * tile_f32_bytes + (2 << 20)
    vmem_bytes = int(min(max(vmem_bytes, 32 << 20), 56 << 20))

    partials = pl.pallas_call(
        kernel,
        out_shape=jax.ShapeDtypeStruct((grid, 1), jnp.float32),
        grid=(grid,),
        in_specs=[
            pl.BlockSpec((tn, c), lambda i: (i, 0)),
            pl.BlockSpec((tn, 1), lambda i: (i, 0)),
        ],
        out_specs=pl.BlockSpec(
            (1, 1), lambda i: (i, 0), memory_space=pltpu.MemorySpace.SMEM
        ),
        compiler_params=pltpu.CompilerParams(
            dimension_semantics=("parallel",),
            vmem_limit_bytes=vmem_bytes,
        ),
    )(logits, target2d)

    return jnp.sum(partials[:, 0]) * jnp.float32(alpha / n)


def focal_loss_ref(logits, target, gamma=GAMMA, alpha=ALPHA):
    """Pure-JAX reference mirroring the PyTorch forward."""
    p = jax.nn.softmax(logits, axis=1)
    logp = jax.nn.log_softmax(logits, axis=1)
    pt = jnp.take_along_axis(p, target[:, None], axis=1)
    log_pt = jnp.take_along_axis(logp, target[:, None], axis=1)
    focus_p = jnp.power(1.0 - pt, gamma)
    weight_nll = alpha * focus_p * (-log_pt)
    return jnp.mean(weight_nll)


if __name__ == "__main__":
    key = jax.random.PRNGKey(0)
    k1, k2 = jax.random.split(key)

    # Lane-dense test: C = 128 classes, N = 40 rows.
    N, C = 40, 128
    logits = jax.random.normal(k1, (N, C), dtype=jnp.float32)
    target = jax.random.randint(k2, (N,), 0, C, dtype=jnp.int32)

    ref = jax.block_until_ready(focal_loss_ref(logits, target))

    # 1) Default byte-driven tile (single grid step, no mask).
    loss = jax.block_until_ready(focal_loss(logits, target))
    assert jnp.allclose(loss, ref, rtol=1e-5, atol=1e-6), (loss, ref)

    # 2) Forced 16-row tile: 3 grid steps, ragged last tile (masked path,
    #    per-tile partial outputs summed in the wrapper).
    loss_t = jax.block_until_ready(focal_loss(logits, target, tile_rows=16))
    assert jnp.allclose(loss_t, ref, rtol=1e-5, atol=1e-6), (loss_t, ref)

    # 3) bf16 logits (half the DMA bytes, f32 upcast inside the kernel).
    logits_bf16 = logits.astype(jnp.bfloat16)
    loss_b = jax.block_until_ready(focal_loss(logits_bf16, target, tile_rows=16))
    ref_b = jax.block_until_ready(
        focal_loss_ref(logits_bf16.astype(jnp.float32), target))
    assert jnp.allclose(loss_b, ref_b, rtol=1e-5, atol=1e-6), (loss_b, ref_b)

    # 4) General (non-2) gamma path exercises the clamped pow branch.
    loss_g = jax.block_until_ready(focal_loss(logits, target, gamma=1.5))
    ref_g = jax.block_until_ready(focal_loss_ref(logits, target, gamma=1.5))
    assert jnp.allclose(loss_g, ref_g, rtol=1e-5, atol=1e-6), (loss_g, ref_g)

    print("KERNEL_OK")
</pallas_src>

<mosaic_0001>
module attributes {stable_mosaic.version = 11 : i64} {
  func.func @kernel(%arg0: i32, %arg1: memref<40x128xf32, #tpu.memory_space<vmem>>, %arg2: memref<40x1xi32, #tpu.memory_space<vmem>>, %arg3: memref<1x1xf32, #tpu.memory_space<smem>>) attributes {dimension_semantics = [#tpu.dimension_semantics<parallel>], iteration_bounds = array<i64: 1>, scalar_prefetch = 0 : i64, scratch_operands = 0 : i64, tpu.core_type = #tpu.core_type<tc>, window_params = [{transform_indices = @transform_0, window_bounds = array<i64: 40, 128>}, {transform_indices = @transform_1, window_bounds = array<i64: 40, 1>}, {transform_indices = @transform_2, window_bounds = array<i64: 1, 1>}]} {
    %c0 = arith.constant 0 : index
    %c0_0 = arith.constant 0 : index
    %0 = vector.load %arg1[%c0, %c0_0] : memref<40x128xf32, #tpu.memory_space<vmem>>, vector<40x128xf32>
    %c0_1 = arith.constant 0 : index
    %c0_2 = arith.constant 0 : index
    %1 = vector.load %arg2[%c0_1, %c0_2] : memref<40x1xi32, #tpu.memory_space<vmem>>, vector<40x1xi32>
    %2 = tpu.iota {dimensions = array<i32: 1>} : vector<1x128xi32>
    %3 = vector.broadcast %2 : vector<1x128xi32> to vector<40x128xi32>
    %4 = vector.broadcast %1 : vector<40x1xi32> to vector<40x128xi32>
    %5 = arith.cmpi eq, %3, %4 : vector<40x128xi32>
    %cst = arith.constant 0.000000e+00 : f32
    %6 = vector.broadcast %cst : f32 to vector<40x128xf32>
    %7 = arith.select %5, %0, %6 : vector<40x128xi1>, vector<40x128xf32>
    %cst_3 = arith.constant dense<0.000000e+00> : vector<40xf32>
    %8 = vector.multi_reduction <add>, %7, %cst_3 [1] : vector<40x128xf32> to vector<40xf32>
    %9 = vector.shape_cast %8 : vector<40xf32> to vector<40x1xf32>
    %cst_4 = arith.constant dense<0xFF800000> : vector<40xf32>
    %10 = vector.multi_reduction <maximumf>, %0, %cst_4 [1] : vector<40x128xf32> to vector<40xf32>
    %11 = vector.shape_cast %10 : vector<40xf32> to vector<40x1xf32>
    %12 = vector.broadcast %11 : vector<40x1xf32> to vector<40x128xf32>
    %13 = arith.subf %0, %12 : vector<40x128xf32>
    %14 = math.exp %13 : vector<40x128xf32>
    %cst_5 = arith.constant dense<0.000000e+00> : vector<40xf32>
    %15 = vector.multi_reduction <add>, %14, %cst_5 [1] : vector<40x128xf32> to vector<40xf32>
    %16 = vector.shape_cast %15 : vector<40xf32> to vector<40x1xf32>
    %17 = arith.subf %9, %11 : vector<40x1xf32>
    %18 = math.log %16 : vector<40x1xf32>
    %19 = arith.subf %17, %18 : vector<40x1xf32>
    %20 = math.exp %19 : vector<40x1xf32>
    %cst_6 = arith.constant 1.000000e+00 : f32
    %21 = vector.broadcast %cst_6 : f32 to vector<40x1xf32>
    %22 = arith.subf %21, %20 : vector<40x1xf32>
    %23 = arith.mulf %22, %22 : vector<40x1xf32>
    %cst_7 = arith.constant 0.000000e+00 : f32
    %24 = vector.broadcast %cst_7 : f32 to vector<40x1xf32>
    %25 = arith.subf %24, %19 : vector<40x1xf32>
    %26 = arith.mulf %23, %25 : vector<40x1xf32>
    %27 = vector.shape_cast %26 : vector<40x1xf32> to vector<1x40x1xf32>
    %cst_8 = arith.constant dense<0.000000e+00> : vector<1xf32>
    %28 = vector.multi_reduction <add>, %27, %cst_8 [1, 2] : vector<1x40x1xf32> to vector<1xf32>
    %29 = vector.shape_cast %28 : vector<1xf32> to vector<1x1x1xf32>
    %30 = vector.extract %29[0, 0, 0] : f32 from vector<1x1x1xf32>
    %c0_9 = arith.constant 0 : index
    %c0_10 = arith.constant 0 : index
    %31 = memref.load %arg3[%c0_9, %c0_10] : memref<1x1xf32, #tpu.memory_space<smem>>
    memref.store %30, %arg3[%c0_9, %c0_10] : memref<1x1xf32, #tpu.memory_space<smem>>
    return
  }
  func.func @transform_0(%arg0: i32) -> (i32, i32) {
    %c0_i32 = arith.constant 0 : i32
    %c0_i32_0 = arith.constant 0 : i32
    return %arg0, %c0_i32 : i32, i32
  }
  func.func @transform_1(%arg0: i32) -> (i32, i32) {
    %c0_i32 = arith.constant 0 : i32
    %c0_i32_0 = arith.constant 0 : i32
    return %arg0, %c0_i32 : i32, i32
  }
  func.func @transform_2(%arg0: i32) -> (i32, i32) {
    %c0_i32 = arith.constant 0 : i32
    %c0_i32_0 = arith.constant 0 : i32
    return %arg0, %c0_i32 : i32, i32
  }
}

</mosaic_0001>

<bundles_post_ra>
// kernel: focal_loss.1
= control target key start
LH: loop header
LB: loop body
LE: loop exit
PB: predicated region body
PF: predicated region fallthrough
CT: control target
= control target key end

     0   :  { %v224_v4 = vmov 0   ;;  %s309_s0 = inlined_call_operand.vmem [shape: f32[40,128], index: 0, kind: input, shape index: {}]   ;;  %s310_s1 = inlined_call_operand.vmem [shape: s32[40,1], index: 1, kind: input, shape index: {}]   ;;  %s311_s2 = inlined_call_operand.hbm [shape: f32[1,1], index: 2, kind: output, shape index: {}]  }
   0x1   :  { %v244_v0 = vld [vmem:[%s309_s0] sm:$0xff]  ;;  %v249_v1 = vld [vmem:[%s309_s0 + $0x10] sm:$0xff]  ;;  %v13_v2 = vld [vmem:[%s309_s0 + $0x8] sm:$0xff]  ;;  %182 = vset.pattern.permute.xlu1 %v224_v4  ;;  %183 = vset.pattern.permute.xlu0 %v224_v4 }
   0x2   :  { %59 = vmax.xlane.f32.xlu0 %v244_v0  ;;  %63 = vmax.xlane.f32.xlu1 %v249_v1  ;;  %v15_v3 = vld [vmem:[%s309_s0 + $0x18] sm:$0xff] }
   0x3   :  { %7 = vsyncpa [#allocation3], 0  ;;  %v16_v5 = vld [vmem:[%s309_s0 + $0x20] sm:$0xff]  ;;  %v19_v7 = vld [vmem:[%s310_s1 + $0x10] sm:$0xff]  ;;  %v22_v27 = vlaneseq  ;;  %vm144_vm5 = vcmask 7168   ;;  %s225_s28 = smov [#allocation2]  }
   0x4   :  { %v17_v6 = vld [vmem:[%s310_s1] sm:$0xff]  ;;  %v20_v8 = vld [vmem:[%s310_s1 + $0x18] sm:$0xff]  ;;  %v18_v9 = vld [vmem:[%s310_s1 + $0x8] sm:$0xff] }
   0x5   :  { %v21_v10 = vld [vmem:[%s310_s1 + $0x20] sm:$0xff]  ;;  %v23_v28 = vand.u32 127, %v22_v27 }
   0x6   :  { %61 = vmax.xlane.f32.xlu0 %v13_v2  ;;  %65 = vmax.xlane.f32.xlu1 %v15_v3 }
   0xa   :  { %67 = vmax.xlane.f32.xlu0 %v16_v5 }
  0x17   :  { %25 = vperm.xlu1 %182, %v17_v6  }
  0x1b   :  { %31 = vperm.xlu1 %182, %v19_v7  }
  0x1f   :  { %34 = vperm.xlu1 %182, %v20_v8  }
  0x20   :  { %28 = vperm.xlu0 %183, %v18_v9  }
  0x23   :  { %37 = vperm.xlu1 %182, %v21_v10  }
  0x8b   :  { %v277_v11 = vpop.xlane.xlu0 %59  ;;  %v279_v12 = vpop.xlane.xlu1 %63 }
  0x8c   :  { %v69_v13 = vsub.f32 %v244_v0, %v277_v11  ;;  %v71_v14 = vsub.f32 %v249_v1, %v279_v12 }
  0x8e   :  { %v74_v15 = vmul.f32 1.442695, %v69_v13  ;;  %v78_v16 = vmul.f32 1.442695, %v71_v14 }
  0x8f   :  { %v285_v17 = vpop.xlane.xlu0 %61  ;;  %v287_v18 = vpop.xlane.xlu1 %65 }
  0x90   :  { %184 = vpow2.f32 %v74_v15  ;;  %v70_v19 = vsub.f32 %v13_v2, %v285_v17  ;;  %v72_v20 = vsub.f32 %v15_v3, %v287_v18 }
  0x91   :  { %186 = vpow2.f32 %v78_v16 }
  0x92   :  { %v76_v21 = vmul.f32 1.442695, %v70_v19  ;;  %v80_v22 = vmul.f32 1.442695, %v72_v20 }
  0x93   :  { %v291_v23 = vpop.xlane.xlu0 %67  ;;  %v26_v26 = vpop.permute.xlu1 %25 }
  0x94   :  { %188 = vpow2.f32 %v76_v21  ;;  %v73_v24 = vsub.f32 %v16_v5, %v291_v23  ;;  %vm39_vm2 = vcmp.eq.s32.totalorder %v23_v28, %v26_v26 }
  0x95   :  { %190 = vpow2.f32 %v80_v22  ;;  %v44_v39 = vsel %vm39_vm2, %v244_v0, 0.0 }
  0x96   :  { %v82_v25 = vmul.f32 1.442695, %v73_v24 }
  0x97   :  { %v32_v30 = vpop.permute.xlu1 %31 }
  0x98   :  { %192 = vpow2.f32 %v82_v25  ;;  %vm41_vm3 = vcmp.eq.s32.totalorder %v23_v28, %v32_v30 }
  0x99   :  { %v46_v41 = vsel %vm41_vm3, %v249_v1, 0.0 }
  0x9b   :  { %v29_v31 = vpop.permute.xlu0 %28  ;;  %v35_v35 = vpop.permute.xlu1 %34 }
  0x9c   :  { %vm40_vm0 = vcmp.eq.s32.totalorder %v23_v28, %v29_v31  ;;  %vm42_vm1 = vcmp.eq.s32.totalorder %v23_v28, %v35_v35 }
  0x9d   :  { %v185_v29 = vpop.eup %184  ;;  %v45_v36 = vsel %vm40_vm0, %v13_v2, 0.0  ;;  %v47_v38 = vsel %vm42_vm1, %v15_v3, 0.0 }
  0x9e   :  { %84 = vadd.xlane.f32.xlu1 %v185_v29  ;;  %v187_v32 = vpop.eup %186 }
  0x9f   :  { %v38_v40 = vpop.permute.xlu1 %37 }
  0xa0   :  { %vm43_vm4 = vcmp.eq.s32.totalorder %v23_v28, %v38_v40 }
  0xa1   :  { %v189_v33 = vpop.eup %188  ;;  %v48_v42 = vsel %vm43_vm4, %v16_v5, 0.0 }
  0xa2   :  { %88 = vadd.xlane.f32.xlu1 %v187_v32  ;;  %86 = vadd.xlane.f32.xlu0 %v189_v33  ;;  %v191_v34 = vpop.eup %190 }
  0xa5   :  { %v193_v37 = vpop.eup %192 }
  0xa6   :  { %90 = vadd.xlane.f32.xlu1 %v191_v34  ;;  %51 = vadd.xlane.f32.xlu0 %v45_v36 }
  0xaa   :  { %92 = vadd.xlane.f32.xlu1 %v193_v37  ;;  %55 = vadd.xlane.f32.xlu0 %v47_v38 }
  0xae   :  { %49 = vadd.xlane.f32.xlu1 %v44_v39 }
  0xb2   :  { %53 = vadd.xlane.f32.xlu1 %v46_v41 }
  0xb6   :  { %57 = vadd.xlane.f32.xlu1 %v48_v42 }
 0x127   :  { %v85_v43 = vpop.xlane.xlu1 %84 }
 0x128   :  { %194 = vlog2.f32 %v85_v43 }
 0x12b   :  { %v89_v44 = vpop.xlane.xlu1 %88  ;;  %v87_v45 = vpop.xlane.xlu0 %86 }
 0x12c   :  { %196 = vlog2.f32 %v89_v44 }
 0x12d   :  { %198 = vlog2.f32 %v87_v45 }
 0x12f   :  { %v91_v46 = vpop.xlane.xlu1 %90  ;;  %v52_v49 = vpop.xlane.xlu0 %51 }
 0x130   :  { %200 = vlog2.f32 %v91_v46  ;;  %v95_v57 = vsub.f32 %v52_v49, %v285_v17 }
 0x133   :  { %v93_v47 = vpop.xlane.xlu1 %92  ;;  %v56_v58 = vpop.xlane.xlu0 %55 }
 0x134   :  { %202 = vlog2.f32 %v93_v47  ;;  %v97_v2 = vsub.f32 %v56_v58, %v287_v18 }
 0x135   :  { %v195_v48 = vpop.eup %194 }
 0x136   :  { %v100_v51 = vmul.f32 0.6931472, %v195_v48 }
 0x137   :  { %v50_v50 = vpop.xlane.xlu1 %49 }
 0x138   :  { %v94_v52 = vsub.f32 %v50_v50, %v277_v11 }
 0x139   :  { %v197_v53 = vpop.eup %196 }
 0x13a   :  { %v199_v54 = vpop.eup %198  ;;  %v109_v55 = vsub.f32 %v94_v52, %v100_v51  ;;  %v104_v60 = vmul.f32 0.6931472, %v197_v53 }
 0x13b   :  { %v102_v56 = vmul.f32 0.6931472, %v199_v54  ;;  %v54_v59 = vpop.xlane.xlu1 %53 }
 0x13c   :  { %v114_v61 = vmul.f32 1.442695, %v109_v55  ;;  %v96_v62 = vsub.f32 %v54_v59, %v279_v12  ;;  %v134_v20 = vsub.f32 0.0, %v109_v55 }
 0x13d   :  { %v201_v63 = vpop.eup %200  ;;  %v110_v0 = vsub.f32 %v95_v57, %v102_v56 }
 0x13e   :  { %v106_v1 = vmul.f32 0.6931472, %v201_v63  ;;  %204 = vpow2.f32 %v114_v61  ;;  %v111_v3 = vsub.f32 %v96_v62, %v104_v60 }
 0x13f   :  { %v116_v4 = vmul.f32 1.442695, %v110_v0  ;;  %v58_v5 = vpop.xlane.xlu1 %57  ;;  %v135_v25 = vsub.f32 0.0, %v110_v0 }
 0x140   :  { %v112_v6 = vsub.f32 %v97_v2, %v106_v1  ;;  %v118_v7 = vmul.f32 1.442695, %v111_v3  ;;  %v98_v11 = vsub.f32 %v58_v5, %v291_v23  ;;  %v136_v29 = vsub.f32 0.0, %v111_v3 }
 0x141   :  { %v203_v8 = vpop.eup %202  ;;  %206 = vpow2.f32 %v116_v4 }
 0x142   :  { %v108_v9 = vmul.f32 0.6931472, %v203_v8  ;;  %v120_v10 = vmul.f32 1.442695, %v112_v6  ;;  %208 = vpow2.f32 %v118_v7  ;;  %v137_v30 = vsub.f32 0.0, %v112_v6 }
 0x144   :  { %210 = vpow2.f32 %v120_v10  ;;  %v113_v12 = vsub.f32 %v98_v11, %v108_v9 }
 0x146   :  { %v122_v13 = vmul.f32 1.442695, %v113_v12  ;;  %v138_v40 = vsub.f32 0.0, %v113_v12 }
 0x148   :  { %212 = vpow2.f32 %v122_v13 }
 0x14b   :  { %v205_v14 = vpop.eup %204 }
 0x14c   :  { %v124_v15 = vsub.f32 1.0, %v205_v14 }
 0x14e   :  { %v207_v16 = vpop.eup %206  ;;  %v129_v17 = vmul.f32 %v124_v15, %v124_v15 }
 0x14f   :  { %v209_v18 = vpop.eup %208  ;;  %v125_v19 = vsub.f32 1.0, %v207_v16 }
 0x150   :  { %v126_v21 = vsub.f32 1.0, %v209_v18  ;;  %v139_v26 = vmul.f32 %v134_v20, %v129_v17 }
 0x151   :  { %v211_v22 = vpop.eup %210  ;;  %v130_v24 = vmul.f32 %v125_v19, %v125_v19 }
 0x152   :  { %v127_v27 = vsub.f32 1.0, %v211_v22  ;;  %v131_v28 = vmul.f32 %v126_v21, %v126_v21  ;;  %v145_v34 = vsel %vm144_vm5, %v139_v26, 0.0 }
 0x153   :  { %v140_v23 = vmul.f32 %v135_v25, %v130_v24 }
 0x154   :  { %v141_v31 = vmul.f32 %v136_v29, %v131_v28  ;;  %v132_v32 = vmul.f32 %v127_v27, %v127_v27 }
 0x155   :  { %v213_v33 = vpop.eup %212  ;;  %v146_v35 = vsel %vm144_vm5, %v140_v23, 0.0 }
 0x156   :  { %v128_v36 = vsub.f32 1.0, %v213_v33  ;;  %v142_v37 = vmul.f32 %v137_v30, %v132_v32  ;;  %v147_v38 = vadd.f32 %v146_v35, %v145_v34  ;;  %v148_v39 = vsel %vm144_vm5, %v141_v31, 0.0 }
 0x158   :  { %v133_v41 = vmul.f32 %v128_v36, %v128_v36  ;;  %v149_v42 = vadd.f32 %v148_v39, %v147_v38  ;;  %v150_v43 = vsel %vm144_vm5, %v142_v37, 0.0 }
 0x15a   :  { %v143_v44 = vmul.f32 %v138_v40, %v133_v41  ;;  %v151_v45 = vadd.f32 %v150_v43, %v149_v42 }
 0x15c   :  { %v152_v46 = vsel %vm144_vm5, %v143_v44, 0.0 }
 0x15d   :  { %v153_v47 = vadd.f32 %v152_v46, %v151_v45 }
 0x15f   :  { %154 = vadd.xlane.f32.xlu0 %v153_v47 }
 0x1e8   :  { %v155_v48 = vpop.xlane.xlu0 %154 }
 0x1e9   :  { %v156_v49 = vrot.slane %v155_v48, 4 }
 0x1eb   :  { %v157_v50 = vadd.f32 %v156_v49, %v155_v48 }
 0x1ed   :  { %v158_v51 = vrot.slane %v157_v50, 2 }
 0x1ef   :  { %v159_v52 = vadd.f32 %v158_v51, %v157_v50 }
 0x1f1   :  { %v160_v53 = vrot.slane %v159_v52, 1 }
 0x1f3   :  { %v161_v54 = vadd.f32 %v160_v53, %v159_v52 }
 0x1f5   :  { %178 = vpush %v161_v54 }
 0x226   :  { %s179_s1 = spop %178 }
 0x227   :  { %164 = sst [smem:[#allocation2]] %s179_s1 }
 0x228   :  { %172 = dma.smem_to_hbm %s225_s28, 16, %s311_s2, [#allocation3]  }
 0x229   :  { %222 = dma.done.wait [#allocation3], 16  }
 0x22a   :  { %223 = vsyncadd [#allocation3], 4294967280 }
 0x22b   :  { %176 = sfence }
 0x22c   :  { %177 = vsyncpa [#allocation3], 1 }

</bundles_post_ra>
